<compile_context>
chip_gen: v7x
topology: tpu7x:2x2x1
jax: 0.10.0
libtpu: 0.0.40
codegen_flags: <defaults>
</compile_context>

<pallas_src>
import math

import jax
import jax.numpy as jnp
from jax.experimental import pallas as pl
from jax.experimental.pallas import tpu as pltpu


def _build_pe(max_len: int, d_model: int, dtype=jnp.float32) -> jnp.ndarray:
    """Sinusoidal positional-encoding table, shape (max_len, 1, d_model)."""
    position = jnp.arange(0, max_len, dtype=jnp.float32)[:, None]            # (max_len, 1)
    div_term = jnp.exp(
        jnp.arange(0, d_model, 2, dtype=jnp.float32) * (-math.log(10000.0) / d_model)
    )                                                                         # (ceil(d/2),)
    angles = position * div_term                                              # (max_len, ceil(d/2))
    pe = jnp.zeros((max_len, d_model), dtype=jnp.float32)
    pe = pe.at[:, 0::2].set(jnp.sin(angles))
    # Truncation makes odd d_model work too (the torch original crashes there).
    pe = pe.at[:, 1::2].set(jnp.cos(angles)[:, : d_model // 2])
    # unsqueeze(0).transpose(0, 1)  ->  (max_len, 1, d_model)
    return pe[:, None, :].astype(dtype)


def _pe_add_kernel(x_ref, pe_ref, o_ref):
    # x_ref: (TS, TB, D); pe_ref: (TS, 1, D) -> broadcast add over the batch axis.
    o_ref[...] = x_ref[...] + pe_ref[...]


def _choose_tiles(seq_len, batch, d_model, itemsize, target_tile_bytes):
    """Pick (seq_tile, batch_tile) so one x tile is ~target_tile_bytes."""
    row_bytes = d_model * itemsize              # one (1, 1, D) row
    full_batch_row = batch * row_bytes          # one (1, B, D) slab
    if full_batch_row <= target_tile_bytes:
        # Full batch per tile; tile only over the sequence axis.
        tb = batch
        ts = min(seq_len, max(1, target_tile_bytes // full_batch_row))
    else:
        # Also tile the batch axis. Sublane rule: batch tile must be a multiple
        # of 8 (or the full batch).
        ts = 1
        tb = (target_tile_bytes // row_bytes) // 8 * 8
        tb = min(max(tb, 8), batch)
    return int(ts), int(tb)


def positional_encoding_forward(
    x: jnp.ndarray,
    pe: jnp.ndarray,
    *,
    force_pallas: bool = False,
    target_tile_bytes: int = 4 << 20,
    min_pallas_bytes: int = 1 << 20,
) -> jnp.ndarray:
    """x: (seq_len, batch, d_model); pe: (max_len, 1, d_model). Returns x + pe[:seq_len]."""
    seq_len, batch, d_model = x.shape
    max_len = pe.shape[0]
    if seq_len > max_len:
        raise ValueError(f"seq_len={seq_len} exceeds positional table max_len={max_len}")
    if pe.shape != (max_len, 1, d_model):
        raise ValueError(f"pe has shape {pe.shape}, expected ({max_len}, 1, {d_model})")

    # Match activation dtype (halves pe HBM traffic for bf16, no mixed-precision add).
    pe_slice = pe[:seq_len].astype(x.dtype)                 # (seq_len, 1, d_model)

    itemsize = jnp.dtype(x.dtype).itemsize
    if not force_pallas and x.size * itemsize < min_pallas_bytes:
        # KB-scale tensors: pallas_call launch + per-step overhead dominates;
        # a fused XLA broadcast add is strictly faster.
        return x + pe_slice

    ts, tb = _choose_tiles(seq_len, batch, d_model, itemsize, target_tile_bytes)
    grid = (pl.cdiv(seq_len, ts), pl.cdiv(batch, tb))

    return pl.pallas_call(
        _pe_add_kernel,
        out_shape=jax.ShapeDtypeStruct((seq_len, batch, d_model), x.dtype),
        grid_spec=pltpu.PrefetchScalarGridSpec(
            num_scalar_prefetch=0,
            grid=grid,
            in_specs=[
                pl.BlockSpec((ts, tb, d_model), lambda i, j: (i, j, 0)),
                # pe's index_map ignores the batch-tile index -> stays resident
                # (not re-DMA'd) while j varies for a fixed seq tile.
                pl.BlockSpec((ts, 1, d_model), lambda i, j: (i, 0, 0)),
            ],
            out_specs=pl.BlockSpec((ts, tb, d_model), lambda i, j: (i, j, 0)),
        ),
        # In-place: output reuses x's HBM buffer.
        input_output_aliases={0: 0},
        compiler_params=pltpu.CompilerParams(
            dimension_semantics=("parallel", "parallel"),
            vmem_limit_bytes=32 * 1024 * 1024,
        ),
    )(x, pe_slice)


if __name__ == "__main__":
    key = jax.random.PRNGKey(0)
    k1, k2, k3 = jax.random.split(key, 3)

    # (key, seq_len, batch, d_model, max_len, dtype, target_tile_bytes)
    tests = [
        # Toy shape implied by the module (single block, full-array tile).
        (k1, 8, 2, 32, 16, jnp.float32, 4 << 20),
        # bf16, multi-step seq grid (exercises pipelining over seq tiles).
        (k2, 64, 8, 128, 128, jnp.bfloat16, 16 << 10),
        # f32, forces batch tiling (grid over both axes, pe resident across batch tiles).
        (k3, 8, 16, 128, 16, jnp.float32, 2 << 10),
    ]

    for k, seq_len, batch, d_model, max_len, dtype, tgt in tests:
        x = jax.random.normal(k, (seq_len, batch, d_model), dtype=jnp.float32).astype(dtype)
        pe = _build_pe(max_len, d_model)

        # Reference computed before the (aliased) kernel call, plain JAX.
        ref = x + pe[:seq_len].astype(dtype)

        out = positional_encoding_forward(x, pe, force_pallas=True, target_tile_bytes=tgt)
        out = jax.block_until_ready(out)

        assert out.shape == (seq_len, batch, d_model)
        assert out.dtype == x.dtype
        atol = 1e-6 if dtype == jnp.float32 else 1e-2
        assert jnp.allclose(
            out.astype(jnp.float32), ref.astype(jnp.float32), atol=atol
        ), f"mismatch vs reference for shape {(seq_len, batch, d_model)} dtype {dtype}"

    print("KERNEL_OK")
</pallas_src>

<mosaic_0001>
module attributes {stable_mosaic.version = 11 : i64} {
  func.func @_pe_add_kernel(%arg0: i32, %arg1: i32, %arg2: memref<8x2x32xf32, #tpu.memory_space<vmem>>, %arg3: memref<8x1x32xf32, #tpu.memory_space<vmem>>, %arg4: memref<8x2x32xf32, #tpu.memory_space<vmem>>) attributes {dimension_semantics = [#tpu.dimension_semantics<parallel>, #tpu.dimension_semantics<parallel>], iteration_bounds = array<i64: 1, 1>, scalar_prefetch = 0 : i64, scratch_operands = 0 : i64, tpu.core_type = #tpu.core_type<tc>, window_params = [{transform_indices = @transform_0, window_bounds = array<i64: 8, 2, 32>}, {transform_indices = @transform_1, window_bounds = array<i64: 8, 1, 32>}, {transform_indices = @transform_2, window_bounds = array<i64: 8, 2, 32>}]} {
    %c0 = arith.constant 0 : index
    %c0_0 = arith.constant 0 : index
    %c0_1 = arith.constant 0 : index
    %0 = vector.load %arg2[%c0, %c0_0, %c0_1] : memref<8x2x32xf32, #tpu.memory_space<vmem>>, vector<8x2x32xf32>
    %c0_2 = arith.constant 0 : index
    %c0_3 = arith.constant 0 : index
    %c0_4 = arith.constant 0 : index
    %1 = vector.load %arg3[%c0_2, %c0_3, %c0_4] : memref<8x1x32xf32, #tpu.memory_space<vmem>>, vector<8x1x32xf32>
    %2 = vector.broadcast %1 : vector<8x1x32xf32> to vector<8x2x32xf32>
    %3 = arith.addf %0, %2 : vector<8x2x32xf32>
    %c0_5 = arith.constant 0 : index
    %c0_6 = arith.constant 0 : index
    %c0_7 = arith.constant 0 : index
    %4 = vector.load %arg4[%c0_5, %c0_6, %c0_7] : memref<8x2x32xf32, #tpu.memory_space<vmem>>, vector<8x2x32xf32>
    tpu.vector_store %arg4[%c0_5, %c0_6, %c0_7], %3 {strides = array<i32>} : memref<8x2x32xf32, #tpu.memory_space<vmem>>, vector<8x2x32xf32>,
    return
  }
  func.func @transform_0(%arg0: i32, %arg1: i32) -> (i32, i32, i32) {
    %c0_i32 = arith.constant 0 : i32
    %c0_i32_0 = arith.constant 0 : i32
    return %arg0, %arg1, %c0_i32 : i32, i32, i32
  }
  func.func @transform_1(%arg0: i32, %arg1: i32) -> (i32, i32, i32) {
    %c0_i32 = arith.constant 0 : i32
    %c0_i32_0 = arith.constant 0 : i32
    %c0_i32_1 = arith.constant 0 : i32
    return %arg0, %c0_i32, %c0_i32_0 : i32, i32, i32
  }
  func.func @transform_2(%arg0: i32, %arg1: i32) -> (i32, i32, i32) {
    %c0_i32 = arith.constant 0 : i32
    %c0_i32_0 = arith.constant 0 : i32
    return %arg0, %arg1, %c0_i32 : i32, i32, i32
  }
}

</mosaic_0001>

<bundles_post_ra>
// kernel: tpu_custom_call.1
= control target key start
LH: loop header
LB: loop body
LE: loop exit
PB: predicated region body
PF: predicated region fallthrough
CT: control target
= control target key end

     0   :  { %7 = vsyncpa [#allocation3], 0  ;;  %s268_s0 = inlined_call_operand.hbm [shape: f32[8,2,32], index: 0, kind: input, shape index: {}, may-alias: {0,2}]   ;;  %s269_s1 = inlined_call_operand.vmem [shape: f32[8,1,32], index: 1, kind: input, shape index: {}]   ;;  %s270_s2 = inlined_call_operand.hbm [shape: f32[8,2,32], index: 2, kind: output, shape index: {}, may-alias: {0,2}]  }
   0x1   :  { %8 = vsyncpa [#allocation4], 0  ;;  %s184_s9 = smov [#allocation2]   ;;  %s136_s13 = scalar_lea.hbm %s268_s0, 256 }
   0x2   :  { %s14_s10 = sshll.u32 %s184_s9, 4  ;;  %p137_p0 = scmp.ne.s32.totalorder %s268_s0, %s136_s13  ;;  %s15_s10 = int_to_ptr.vmem [resolvable:$true] %s14_s10 }
   0x3   :  { %p140_p1 = scmp.lt.u32.totalorder %s136_s13, %s268_s0 }
   0x5   :  { %p142_p2 = pnand %p140_p1, %p137_p0 }
   0x7   :  { %145 = shalt.err (!%p142_p2)
}
   0x8   :  { %s146_s18 = scalar_lea.vmem %s15_s10, 256  ;;  %p151_p4 = scmp.lt.s32.totalorder %s15_s10, %s15_s10 }
   0x9   :  { %p147_p3 = scmp.ne.s32.totalorder %s15_s10, %s146_s18  ;;  %p152_p5 = scmp.lt.s32.totalorder %s146_s18, %s146_s18 }
   0xb   :  { %p153_p6 = por %p152_p5, %p151_p4 }
   0xd   :  { %p154_p7 = pnand %p153_p6, %p147_p3 }
   0xf   :  { %157 = shalt.err (!%p154_p7)
}
  0x10   :  { %s185_s19 = smov 32   ;;  %s186_s20 = smov 2  }
  0x11   :  { %20 = dma.hbm_to_vmem [thread:$0]  %s268_s0, 256, %s15_s10, [#allocation3], %s185_s19, %s185_s19, %s186_s20  }
  0x12   :  { %180 = dma.done.wait [#allocation3], 256  }
  0x13   :  { %181 = vsyncadd [#allocation3], 4294967040  ;;  %vm98_vm0 = vcmask 254976   ;;  %s187_s23 = smov [#allocation5]   ;;  %v26_v0 = vld [vmem:[#allocation2] sm:$0x3] }
  0x14   :  { %s218_s24 = sshll.u32 %s187_s23, 4  ;;  %v124_v1 = vld [vmem:[%s269_s1] ss:$0 sm:$0xff]  ;;  %v27_v2 = vld [vmem:[#allocation2 + $0x2] sm:$0x3]  ;;  %s113_s24 = int_to_ptr.vmem [resolvable:$true] %s218_s24 }
  0x15   :  { %v90_v3 = vadd.f32 %v124_v1, %v26_v0  ;;  %v125_v4 = vld [vmem:[%s269_s1 + $0x1] ss:$0 sm:$0xff]  ;;  %v28_v5 = vld [vmem:[#allocation2 + $0x4] sm:$0x3]  ;;  %v126_v6 = vld [vmem:[%s269_s1 + $0x2] ss:$0 sm:$0xff]  ;;  %p163_p9 = scmp.lt.s32.totalorder %s113_s24, %s113_s24 }
  0x16   :  { %v91_v7 = vadd.f32 %v125_v4, %v27_v2  ;;  %v92_v8 = vadd.f32 %v126_v6, %v28_v5  ;;  %v29_v9 = vld [vmem:[#allocation2 + $0x6] sm:$0x3]  ;;  %v127_v10 = vld [vmem:[%s269_s1 + $0x3] ss:$0 sm:$0xff]  ;;  %v30_v11 = vld [vmem:[#allocation2 + $0x8] sm:$0x3] }
  0x17   :  { %99 = vst.msk [vmem:[#allocation5] sm:$0x3] %vm98_vm0, %v90_v3  ;;  %v93_v12 = vadd.f32 %v127_v10, %v29_v9  ;;  %v128_v13 = vld [vmem:[%s269_s1 + $0x4] ss:$0 sm:$0xff]  ;;  %v31_v14 = vld [vmem:[#allocation2 + $0xa] sm:$0x3] }
  0x18   :  { %v129_v15 = vld [vmem:[%s269_s1 + $0x5] ss:$0 sm:$0xff]  ;;  %100 = vst.msk [vmem:[#allocation5 + $0x2] sm:$0x3] %vm98_vm0, %v91_v7  ;;  %101 = vst.msk [vmem:[#allocation5 + $0x4] sm:$0x3] %vm98_vm0, %v92_v8  ;;  %v94_v16 = vadd.f32 %v128_v13, %v30_v11 }
  0x19   :  { %v95_v17 = vadd.f32 %v129_v15, %v31_v14  ;;  %v32_v18 = vld [vmem:[#allocation2 + $0xc] sm:$0x3]  ;;  %v130_v19 = vld [vmem:[%s269_s1 + $0x6] ss:$0 sm:$0xff]  ;;  %v33_v20 = vld [vmem:[#allocation2 + $0xe] sm:$0x3] }
  0x1a   :  { %102 = vst.msk [vmem:[#allocation5 + $0x6] sm:$0x3] %vm98_vm0, %v93_v12  ;;  %v96_v21 = vadd.f32 %v130_v19, %v32_v18  ;;  %v131_v22 = vld [vmem:[%s269_s1 + $0x7] ss:$0 sm:$0xff]  ;;  %103 = vst.msk [vmem:[#allocation5 + $0x8] sm:$0x3] %vm98_vm0, %v94_v16 }
  0x1b   :  { %104 = vst.msk [vmem:[#allocation5 + $0xa] sm:$0x3] %vm98_vm0, %v95_v17  ;;  %v97_v23 = vadd.f32 %v131_v22, %v33_v20  ;;  %s158_s12 = scalar_lea.vmem %s113_s24, 256 }
  0x1c   :  { %105 = vst.msk [vmem:[#allocation5 + $0xc] sm:$0x3] %vm98_vm0, %v96_v21  ;;  %p159_p8 = scmp.ne.s32.totalorder %s113_s24, %s158_s12  ;;  %p164_p10 = scmp.lt.s32.totalorder %s158_s12, %s158_s12 }
  0x1d   :  { %106 = vst.msk [vmem:[#allocation5 + $0xe] sm:$0x3] %vm98_vm0, %v97_v23 }
  0x1e   :  { %p165_p11 = por %p164_p10, %p163_p9 }
  0x20   :  { %p166_p12 = pnand %p165_p11, %p159_p8 }
  0x22   :  { %169 = shalt.err (!%p166_p12)
}
  0x23   :  { %s170_s1 = scalar_lea.hbm %s270_s2, 256 }
  0x24   :  { %p171_p13 = scmp.ne.s32.totalorder %s270_s2, %s170_s1  ;;  %p174_p0 = scmp.lt.u32.totalorder %s170_s1, %s270_s2 }
  0x26   :  { %p176_p1 = pnand %p174_p0, %p171_p13 }
  0x28   :  { %179 = shalt.err (!%p176_p1)
}
  0x29   :  { %118 = dma.vmem_to_hbm [thread:$0]  %s113_s24, 256, %s270_s2, [#allocation4], %s185_s19, %s185_s19, %s186_s20  }
  0x2a   :  { %182 = dma.done.wait [#allocation4], 256  }
  0x2b   :  { %183 = vsyncadd [#allocation4], 4294967040 }
  0x2c   :  { %122 = vsyncpa [#allocation3], 1 }
  0x2d   :  { %123 = vsyncpa [#allocation4], 1 }

</bundles_post_ra>
